<compile_context>
chip_gen: v7x
topology: tpu7x:2x2x1
jax: 0.10.0
libtpu: 0.0.40
codegen_flags: <defaults>
</compile_context>

<pallas_src>
import jax
import jax.numpy as jnp
from jax.experimental import pallas as pl
from jax.experimental.pallas import tpu as pltpu


_LANES = 512               # lane-dense last dim (multiple of 128)
_TARGET_BLOCK_ROWS = 2048  # 2048 * 512 * 4B = 4 MiB per f32 input buffer


def _abs_cubed_partial_kernel(x_ref, o_ref):
    """Per-tile: sum(|x|^3) folded down to an (8, LANES) partial (VPU-only)."""
    lanes = o_ref.shape[-1]
    x = x_ref[...].astype(jnp.float32)
    a = jnp.abs(x)
    c = a * a * a
    # (block_m, lanes) -> (block_m//8, 8, lanes); leading-axis sum is a pure
    # cross-vreg elementwise add (no XLU), last-two-dim tiling is preserved.
    o_ref[...] = jnp.sum(c.reshape(-1, 8, lanes), axis=0)


def _round_up(x: int, m: int) -> int:
    return ((x + m - 1) // m) * m


def fused_sum_abs_cubed(factors,
                        lanes: int = _LANES,
                        target_block_rows: int = _TARGET_BLOCK_ROWS) -> jax.Array:
    """sum_f sum(|f|^3) over a list of arrays, in one Pallas launch."""
    pieces = [jnp.ravel(f) for f in factors]
    common_dtype = jnp.result_type(*[p.dtype for p in pieces])
    pieces = [p.astype(common_dtype) for p in pieces]

    total = sum(int(p.size) for p in pieces)
    rows = pl.cdiv(total, lanes)

    # Pick a row-block <= target that minimizes tail padding (< 8 rows/block).
    num_blocks = pl.cdiv(rows, target_block_rows)
    block_m = _round_up(pl.cdiv(rows, num_blocks), 8)
    padded_rows = num_blocks * block_m

    pad = padded_rows * lanes - total
    if pad:
        pieces.append(jnp.zeros((pad,), common_dtype))
    x2d = jnp.concatenate(pieces).reshape(padded_rows, lanes)

    partials = pl.pallas_call(
        _abs_cubed_partial_kernel,
        out_shape=jax.ShapeDtypeStruct((num_blocks * 8, lanes), jnp.float32),
        grid_spec=pltpu.PrefetchScalarGridSpec(
            num_scalar_prefetch=0,
            grid=(num_blocks,),
            in_specs=[pl.BlockSpec((block_m, lanes), lambda i: (i, 0))],
            out_specs=pl.BlockSpec((8, lanes), lambda i: (i, 0)),
        ),
        compiler_params=pltpu.CompilerParams(
            dimension_semantics=("parallel",),
            vmem_limit_bytes=32 * 1024 * 1024,
        ),
    )(x2d)

    # Tiny final reduction over the partial blocks stays in JAX.
    return jnp.sum(partials)


def n3_forward(factor1, factor2, factor3, weight: float) -> jax.Array:
    """JAX/Pallas equivalent of N3.forward (weight applied once, outside)."""
    factors = list(factor1) + list(factor2) + list(factor3)
    total_abs3 = fused_sum_abs_cubed(factors)
    denom = factor1[0].shape[0] + factor2[0].shape[0] + factor3[0].shape[0]
    return (jnp.float32(weight) * total_abs3) / denom


def _n3_reference(factor1, factor2, factor3, weight: float) -> jax.Array:
    norm = jnp.float32(0.0)
    for f in list(factor1) + list(factor2) + list(factor3):
        a = jnp.abs(f.astype(jnp.float32))
        norm = norm + weight * jnp.sum(a ** 3)
    denom = factor1[0].shape[0] + factor2[0].shape[0] + factor3[0].shape[0]
    return norm / denom


if __name__ == "__main__":
    key = jax.random.PRNGKey(0)
    weight = 0.05

    batch, rank = 16, 32  # small KGE-style factor shapes: (batch, rank)
    k1, k2, k3, k4, k5, k6 = jax.random.split(key, 6)

    # Each factor is a tuple of tensors, mirroring the PyTorch module.
    factor1 = (jax.random.normal(k1, (batch, rank), jnp.float32),
               jax.random.normal(k2, (batch, rank), jnp.float32))
    factor2 = (jax.random.normal(k3, (batch, rank), jnp.float32),
               jax.random.normal(k4, (batch, rank), jnp.float32))
    factor3 = (jax.random.normal(k5, (batch, rank), jnp.float32),
               jax.random.normal(k6, (batch, rank), jnp.float32))

    out = n3_forward(factor1, factor2, factor3, weight)
    out = jax.block_until_ready(out)

    ref = _n3_reference(factor1, factor2, factor3, weight)
    assert jnp.allclose(out, ref, rtol=1e-5, atol=1e-5), (out, ref)

    print("KERNEL_OK")
</pallas_src>

<mosaic_0001>
module attributes {stable_mosaic.version = 11 : i64} {
  func.func @_abs_cubed_partial_kernel(%arg0: i32, %arg1: memref<8x512xf32, #tpu.memory_space<vmem>>, %arg2: memref<8x512xf32, #tpu.memory_space<vmem>>) attributes {dimension_semantics = [#tpu.dimension_semantics<parallel>], iteration_bounds = array<i64: 1>, scalar_prefetch = 0 : i64, scratch_operands = 0 : i64, tpu.core_type = #tpu.core_type<tc>, window_params = [{transform_indices = @transform_0, window_bounds = array<i64: 8, 512>}, {transform_indices = @transform_1, window_bounds = array<i64: 8, 512>}]} {
    %c0 = arith.constant 0 : index
    %c0_0 = arith.constant 0 : index
    %0 = vector.load %arg1[%c0, %c0_0] : memref<8x512xf32, #tpu.memory_space<vmem>>, vector<8x512xf32>
    %1 = math.absf %0 : vector<8x512xf32>
    %2 = arith.mulf %1, %1 : vector<8x512xf32>
    %3 = arith.mulf %2, %1 : vector<8x512xf32>
    %4 = vector.shape_cast %3 : vector<8x512xf32> to vector<1x8x512xf32>
    %cst = arith.constant dense<0.000000e+00> : vector<8x512xf32>
    %5 = vector.multi_reduction <add>, %4, %cst [0] : vector<1x8x512xf32> to vector<8x512xf32>
    %c0_1 = arith.constant 0 : index
    %c0_2 = arith.constant 0 : index
    %6 = vector.load %arg2[%c0_1, %c0_2] : memref<8x512xf32, #tpu.memory_space<vmem>>, vector<8x512xf32>
    tpu.vector_store %arg2[%c0_1, %c0_2], %5 {strides = array<i32>} : memref<8x512xf32, #tpu.memory_space<vmem>>, vector<8x512xf32>,
    return
  }
  func.func @transform_0(%arg0: i32) -> (i32, i32) {
    %c0_i32 = arith.constant 0 : i32
    %c0_i32_0 = arith.constant 0 : i32
    return %arg0, %c0_i32 : i32, i32
  }
  func.func @transform_1(%arg0: i32) -> (i32, i32) {
    %c0_i32 = arith.constant 0 : i32
    %c0_i32_0 = arith.constant 0 : i32
    return %arg0, %c0_i32 : i32, i32
  }
}

</mosaic_0001>

<bundles_post_ra>
// kernel: tpu_custom_call.1
= control target key start
LH: loop header
LB: loop body
LE: loop exit
PB: predicated region body
PF: predicated region fallthrough
CT: control target
= control target key end

     0   :  { %6 = vsyncpa [#allocation3], 0  ;;  %s146_s0 = inlined_call_operand.hbm [shape: f32[8,512], index: 0, kind: input, shape index: {}]   ;;  %s147_s1 = inlined_call_operand.hbm [shape: f32[8,512], index: 1, kind: output, shape index: {}]  }
   0x1   :  { %7 = vsyncpa [#allocation4], 0  ;;  %s110_s6 = smov [#allocation2]   ;;  %s62_s10 = scalar_lea.hbm %s146_s0, 512 }
   0x2   :  { %s14_s7 = sshll.u32 %s110_s6, 4  ;;  %p63_p0 = scmp.ne.s32.totalorder %s146_s0, %s62_s10  ;;  %s15_s7 = int_to_ptr.vmem [resolvable:$true] %s14_s7 }
   0x3   :  { %p66_p1 = scmp.lt.u32.totalorder %s62_s10, %s146_s0 }
   0x5   :  { %p68_p2 = pnand %p66_p1, %p63_p0 }
   0x7   :  { %71 = shalt.err (!%p68_p2)
}
   0x8   :  { %s72_s15 = scalar_lea.vmem %s15_s7, 512  ;;  %p77_p4 = scmp.lt.s32.totalorder %s15_s7, %s15_s7 }
   0x9   :  { %p73_p3 = scmp.ne.s32.totalorder %s15_s7, %s72_s15  ;;  %p78_p5 = scmp.lt.s32.totalorder %s72_s15, %s72_s15 }
   0xb   :  { %p79_p6 = por %p78_p5, %p77_p4 }
   0xd   :  { %p80_p7 = pnand %p79_p6, %p73_p3 }
   0xf   :  { %83 = shalt.err (!%p80_p7)
}
  0x10   :  { %17 = dma.hbm_to_vmem [thread:$0]  %s146_s0, 512, %s15_s7, [#allocation3]  }
  0x11   :  { %106 = dma.done.wait [#allocation3], 512  }
  0x12   :  { %107 = vsyncadd [#allocation3], 4294966784  ;;  %v21_v0 = vld [vmem:[#allocation2] sm:$0xff]  ;;  %v22_v1 = vld [vmem:[#allocation2 + $0x8] sm:$0xff]  ;;  %s111_s18 = smov [#allocation5]  }
  0x13   :  { %v23_v2 = vld [vmem:[#allocation2 + $0x10] sm:$0xff]  ;;  %v25_v3 = vand.u32 2147483647, %v21_v0  ;;  %v26_v4 = vand.u32 2147483647, %v22_v1  ;;  %v24_v6 = vld [vmem:[#allocation2 + $0x18] sm:$0xff] }
  0x14   :  { %v27_v5 = vand.u32 2147483647, %v23_v2  ;;  %v28_v10 = vand.u32 2147483647, %v24_v6  ;;  %s51_s19 = sshll.u32 %s111_s18, 4  ;;  %s52_s19 = int_to_ptr.vmem [resolvable:$true] %s51_s19 }
  0x15   :  { %v29_v7 = vmul.f32 %v25_v3, %v25_v3  ;;  %v30_v8 = vmul.f32 %v26_v4, %v26_v4  ;;  %s84_s0 = scalar_lea.vmem %s52_s19, 512  ;;  %p89_p9 = scmp.lt.s32.totalorder %s52_s19, %s52_s19 }
  0x16   :  { %v31_v9 = vmul.f32 %v27_v5, %v27_v5  ;;  %v32_v14 = vmul.f32 %v28_v10, %v28_v10  ;;  %p85_p8 = scmp.ne.s32.totalorder %s52_s19, %s84_s0  ;;  %p90_p10 = scmp.lt.s32.totalorder %s84_s0, %s84_s0 }
  0x17   :  { %v33_v11 = vmul.f32 %v29_v7, %v25_v3  ;;  %v34_v12 = vmul.f32 %v30_v8, %v26_v4 }
  0x18   :  { %v35_v13 = vmul.f32 %v31_v9, %v27_v5  ;;  %v36_v15 = vmul.f32 %v32_v14, %v28_v10  ;;  %p91_p11 = por %p90_p10, %p89_p9 }
  0x19   :  { %41 = vst [vmem:[#allocation5] sm:$0xff] %v33_v11  ;;  %42 = vst [vmem:[#allocation5 + $0x8] sm:$0xff] %v34_v12 }
  0x1a   :  { %43 = vst [vmem:[#allocation5 + $0x10] sm:$0xff] %v35_v13  ;;  %44 = vst [vmem:[#allocation5 + $0x18] sm:$0xff] %v36_v15  ;;  %p92_p12 = pnand %p91_p11, %p85_p8 }
  0x1c   :  { %95 = shalt.err (!%p92_p12)
}
  0x1d   :  { %s96_s22 = scalar_lea.hbm %s147_s1, 512 }
  0x1e   :  { %p97_p13 = scmp.ne.s32.totalorder %s147_s1, %s96_s22  ;;  %p100_p0 = scmp.lt.u32.totalorder %s96_s22, %s147_s1 }
  0x20   :  { %p102_p1 = pnand %p100_p0, %p97_p13 }
  0x22   :  { %105 = shalt.err (!%p102_p1)
}
  0x23   :  { %54 = dma.vmem_to_hbm [thread:$0]  %s52_s19, 512, %s147_s1, [#allocation4]  }
  0x24   :  { %108 = dma.done.wait [#allocation4], 512  }
  0x25   :  { %109 = vsyncadd [#allocation4], 4294966784 }
  0x26   :  { %58 = vsyncpa [#allocation3], 1 }
  0x27   :  { %59 = vsyncpa [#allocation4], 1 }

</bundles_post_ra>
